<compile_context>
chip_gen: v5e
topology: v5e:2x2
jax: 0.10.0
libtpu: 0.0.40
codegen_flags: <defaults>
</compile_context>

<pallas_src>
import functools

import jax
import jax.numpy as jnp
from jax.experimental import pallas as pl
from jax.experimental.pallas import tpu as pltpu

BN_EPS = 1e-5


def _conv_tile(x_ref, w, col0, *, tl, c1, c2, k, s):
    """One (C2, TL) conv-output tile from the resident (C1, L_pad) x slab.

    x_ref: VMEM ref of shape (C1, L_pad) (already zero-padded along L).
    w:     loaded weights of shape (k, C2, C1).
    col0:  first padded-x column needed by this output tile (static int when
           there is a single L tile, else derived from pl.program_id).
    """
    acc = jnp.zeros((c2, tl), dtype=jnp.float32)

    def x_slice(t):
        if s == 1:
            return x_ref[:, pl.ds(col0 + t, tl)]                 # (C1, TL)
        return x_ref[:, pl.ds(col0 + t, tl, stride=s)]           # (C1, TL)

    if c1 * k <= 64:
        # Tiny contraction depth: unrolled VPU multiply-accumulates.  An MXU
        # matmul at depth C1*k (e.g. 12) would be >90% zero padding.
        for t in range(k):
            xs = x_slice(t)
            wt = w[t]                                            # (C2, C1)
            for ci in range(c1):
                acc = acc + wt[:, ci:ci + 1] * xs[ci:ci + 1, :]  # (C2, TL)
    else:
        # Large C1: per-tap MXU matmuls, contraction depth = C1.
        for t in range(k):
            acc = acc + jnp.dot(w[t], x_slice(t),
                                preferred_element_type=jnp.float32)
    return acc


def _conv_stats_kernel(x_ref, w_ref, stats_ref, *, c1, c2, k, s, tl, n_lt):
    """Pass 1: accumulate per-channel sum(y) / sum(y*y) of the bias-free conv."""
    n_idx = pl.program_id(0)
    l_idx = pl.program_id(1)

    @pl.when((n_idx == 0) & (l_idx == 0))
    def _():
        stats_ref[...] = jnp.zeros_like(stats_ref)

    col0 = 0 if n_lt == 1 else l_idx * (tl * s)
    y = _conv_tile(x_ref, w_ref[...], col0, tl=tl, c1=c1, c2=c2, k=k, s=s)
    stats_ref[:, 0:1] += jnp.sum(y, axis=1, keepdims=True)       # (C2, 1)
    stats_ref[:, 1:2] += jnp.sum(y * y, axis=1, keepdims=True)   # (C2, 1)


def _conv_bn_relu_kernel(x_ref, w_ref, scale_ref, shift_ref, out_ref,
                         *, c1, c2, k, s, tl, n_lt):
    """Pass 2: recompute conv tile, fused scale*y + shift, ReLU, write NCL."""
    l_idx = pl.program_id(1)
    col0 = 0 if n_lt == 1 else l_idx * (tl * s)
    y = _conv_tile(x_ref, w_ref[...], col0, tl=tl, c1=c1, c2=c2, k=k, s=s)
    out = y * scale_ref[...] + shift_ref[...]        # (C2,1) broadcast on lanes
    out_ref[...] = jnp.maximum(out, 0.0).astype(out_ref.dtype)


def _pick_l_tile(l_out):
    # Prefer lane-dense tiles (multiples of 128) that divide L_out exactly so
    # the stats pass never sees a partial tile; small/awkward L_out -> one tile.
    for cand in (2048, 1024, 512, 256, 128):
        if l_out % cand == 0:
            return cand
    return l_out


@functools.partial(jax.jit, static_argnames=("k", "s"))
def conv_module_forward(x, w, b, gamma, beta, *, k, s):
    """x: (N, C1, L)  w: (C2, C1, k)  b/gamma/beta: (C2,) -> (N, C2, L_out).

    The Conv1d bias `b` cancels exactly under batch-statistic BatchNorm
    (mean subtraction removes it), so the kernels never read it.
    """
    del b  # cancelled by batch-stat mean subtraction (training-mode BN)
    n, c1, length = x.shape
    c2 = w.shape[0]
    pad = k // 2
    l_out = (length + 2 * pad - k) // s + 1
    l_pad = length + 2 * pad

    x_pad = jnp.pad(x.astype(jnp.float32), ((0, 0), (0, 0), (pad, pad)))
    wk = jnp.transpose(w.astype(jnp.float32), (2, 0, 1))         # (k, C2, C1)

    tl = _pick_l_tile(l_out)
    n_lt = l_out // tl

    # x slab is resident per batch element (index constant over the inner L
    # axis -> fetched once); weights are resident for the whole grid.
    x_spec = pl.BlockSpec((None, c1, l_pad), lambda i, j: (i, 0, 0))
    w_spec = pl.BlockSpec((k, c2, c1), lambda i, j: (0, 0, 0))
    vmem_limit = 32 * 1024 * 1024  # explicit: fits v7x's 64 MiB VMEM

    # ---- Pass 1: global per-channel sum / sum-of-squares --------------------
    stats = pl.pallas_call(
        functools.partial(_conv_stats_kernel,
                          c1=c1, c2=c2, k=k, s=s, tl=tl, n_lt=n_lt),
        out_shape=jax.ShapeDtypeStruct((c2, 2), jnp.float32),
        grid=(n, n_lt),
        in_specs=[x_spec, w_spec],
        out_specs=pl.BlockSpec((c2, 2), lambda i, j: (0, 0)),
        compiler_params=pltpu.CompilerParams(
            dimension_semantics=("arbitrary", "arbitrary"),
            vmem_limit_bytes=vmem_limit),
    )(x_pad, wk)

    # Fold BN into one scale/shift per channel (tiny C2-length vector math).
    count = jnp.float32(n * l_out)
    mean = stats[:, 0] / count
    var = stats[:, 1] / count - mean * mean          # E[y^2] - mean^2 (biased)
    scale = gamma.astype(jnp.float32) * jax.lax.rsqrt(var + BN_EPS)
    shift = beta.astype(jnp.float32) - mean * scale

    # ---- Pass 2: normalize + ReLU, write (N, C2, L_out) directly ------------
    out = pl.pallas_call(
        functools.partial(_conv_bn_relu_kernel,
                          c1=c1, c2=c2, k=k, s=s, tl=tl, n_lt=n_lt),
        out_shape=jax.ShapeDtypeStruct((n, c2, l_out), jnp.float32),
        grid=(n, n_lt),
        in_specs=[x_spec, w_spec,
                  pl.BlockSpec((c2, 1), lambda i, j: (0, 0)),
                  pl.BlockSpec((c2, 1), lambda i, j: (0, 0))],
        out_specs=pl.BlockSpec((None, c2, tl), lambda i, j: (i, 0, j)),
        compiler_params=pltpu.CompilerParams(
            dimension_semantics=("parallel", "parallel"),
            vmem_limit_bytes=vmem_limit),
    )(x_pad, wk, scale.reshape(c2, 1), shift.reshape(c2, 1))
    return out


def _reference(x, w, b, gamma, beta, k, s):
    # Pure-JAX reference: lax conv (with bias) + batch-stat BN + ReLU.
    pad = k // 2
    y = jax.lax.conv_general_dilated(
        x, w, window_strides=(s,), padding=[(pad, pad)],
        dimension_numbers=("NCH", "OIH", "NCH"))
    y = y + b[None, :, None]
    mean = jnp.mean(y, axis=(0, 2), keepdims=True)
    var = jnp.mean((y - mean) ** 2, axis=(0, 2), keepdims=True)
    y_hat = (y - mean) / jnp.sqrt(var + BN_EPS)
    out = y_hat * gamma[None, :, None] + beta[None, :, None]
    return jnp.maximum(out, 0.0)


if __name__ == "__main__":
    # Conv(c1=4, c2=8, k=3, s=1) on input (N=2, C1=4, L=16).
    N, C1, C2, L, K, S = 2, 4, 8, 16, 3, 1

    key = jax.random.PRNGKey(0)
    kx, kw, kb = jax.random.split(key, 3)
    x = jax.random.normal(kx, (N, C1, L), dtype=jnp.float32)
    w = jax.random.normal(kw, (C2, C1, K), dtype=jnp.float32) * 0.1
    b = jax.random.normal(kb, (C2,), dtype=jnp.float32) * 0.1
    gamma = jnp.ones((C2,), dtype=jnp.float32)   # nn.BatchNorm1d default weight
    beta = jnp.zeros((C2,), dtype=jnp.float32)   # nn.BatchNorm1d default bias

    out = conv_module_forward(x, w, b, gamma, beta, k=K, s=S)
    out = jax.block_until_ready(out)

    ref = _reference(x, w, b, gamma, beta, K, S)
    l_out = (L + 2 * (K // 2) - K) // S + 1
    assert out.shape == (N, C2, l_out), out.shape
    assert jnp.allclose(out, ref, atol=1e-4, rtol=1e-4), \
        float(jnp.max(jnp.abs(out - ref)))

    print("KERNEL_OK")
</pallas_src>

<mosaic_0001>
module attributes {stable_mosaic.version = 11 : i64} {
  func.func @_conv_stats_kernel(%arg0: i32, %arg1: i32, %arg2: memref<1x4x18xf32, #tpu.memory_space<vmem>>, %arg3: memref<3x8x4xf32, #tpu.memory_space<vmem>>, %arg4: memref<8x2xf32, #tpu.memory_space<vmem>>) attributes {dimension_semantics = [#tpu.dimension_semantics<arbitrary>, #tpu.dimension_semantics<arbitrary>], iteration_bounds = array<i64: 2, 1>, scalar_prefetch = 0 : i64, scratch_operands = 0 : i64, tpu.core_type = #tpu.core_type<tc>, window_params = [{transform_indices = @transform_0, window_bounds = array<i64: 1, 4, 18>}, {pipeline_mode = #tpu.pipeline_mode<synchronous>, transform_indices = @transform_1, window_bounds = array<i64: 3, 8, 4>}, {pipeline_mode = #tpu.pipeline_mode<synchronous>, transform_indices = @transform_2, window_bounds = array<i64: 8, 2>}]} {
    %c0_i32 = arith.constant 0 : i32
    %0 = arith.cmpi eq, %arg0, %c0_i32 : i32
    %c0_i32_0 = arith.constant 0 : i32
    %1 = arith.cmpi eq, %arg1, %c0_i32_0 : i32
    %2 = arith.andi %0, %1 : i1
    %3 = arith.extui %2 : i1 to i32
    %c0_i32_1 = arith.constant 0 : i32
    %4 = arith.cmpi ne, %3, %c0_i32_1 : i32
    scf.if %4 {
      %cst_21 = arith.constant 0.000000e+00 : f32
      %102 = vector.broadcast %cst_21 : f32 to vector<8x2xf32>
      %c0_22 = arith.constant 0 : index
      %c0_23 = arith.constant 0 : index
      %103 = vector.load %arg4[%c0_22, %c0_23] : memref<8x2xf32, #tpu.memory_space<vmem>>, vector<8x2xf32>
      tpu.vector_store %arg4[%c0_22, %c0_23], %102 {strides = array<i32>} : memref<8x2xf32, #tpu.memory_space<vmem>>, vector<8x2xf32>,
    } else {
    }
    %c0 = arith.constant 0 : index
    %c0_2 = arith.constant 0 : index
    %c0_3 = arith.constant 0 : index
    %5 = vector.load %arg3[%c0, %c0_2, %c0_3] : memref<3x8x4xf32, #tpu.memory_space<vmem>>, vector<3x8x4xf32>
    %cst = arith.constant 0.000000e+00 : f32
    %6 = vector.broadcast %cst : f32 to vector<8x16xf32>
    %c0_4 = arith.constant 0 : index
    %c0_5 = arith.constant 0 : index
    %c0_6 = arith.constant 0 : index
    %7 = vector.load %arg2[%c0_4, %c0_5, %c0_6] : memref<1x4x18xf32, #tpu.memory_space<vmem>>, vector<1x4x16xf32>
    %8 = vector.shape_cast %7 : vector<1x4x16xf32> to vector<4x16xf32>
    %9 = vector.extract_strided_slice %5 {offsets = [0, 0, 0], sizes = [1, 8, 4], strides = [1, 1, 1]} : vector<3x8x4xf32> to vector<1x8x4xf32>
    %10 = vector.shape_cast %9 : vector<1x8x4xf32> to vector<8x4xf32>
    %11 = vector.extract_strided_slice %10 {offsets = [0, 0], sizes = [8, 1], strides = [1, 1]} : vector<8x4xf32> to vector<8x1xf32>
    %12 = vector.extract_strided_slice %8 {offsets = [0, 0], sizes = [1, 16], strides = [1, 1]} : vector<4x16xf32> to vector<1x16xf32>
    %13 = vector.broadcast %11 : vector<8x1xf32> to vector<8x16xf32>
    %14 = vector.broadcast %12 : vector<1x16xf32> to vector<8x16xf32>
    %15 = arith.mulf %13, %14 : vector<8x16xf32>
    %16 = arith.addf %6, %15 : vector<8x16xf32>
    %17 = vector.extract_strided_slice %10 {offsets = [0, 1], sizes = [8, 1], strides = [1, 1]} : vector<8x4xf32> to vector<8x1xf32>
    %18 = vector.extract_strided_slice %8 {offsets = [1, 0], sizes = [1, 16], strides = [1, 1]} : vector<4x16xf32> to vector<1x16xf32>
    %19 = vector.broadcast %17 : vector<8x1xf32> to vector<8x16xf32>
    %20 = vector.broadcast %18 : vector<1x16xf32> to vector<8x16xf32>
    %21 = arith.mulf %19, %20 : vector<8x16xf32>
    %22 = arith.addf %16, %21 : vector<8x16xf32>
    %23 = vector.extract_strided_slice %10 {offsets = [0, 2], sizes = [8, 1], strides = [1, 1]} : vector<8x4xf32> to vector<8x1xf32>
    %24 = vector.extract_strided_slice %8 {offsets = [2, 0], sizes = [1, 16], strides = [1, 1]} : vector<4x16xf32> to vector<1x16xf32>
    %25 = vector.broadcast %23 : vector<8x1xf32> to vector<8x16xf32>
    %26 = vector.broadcast %24 : vector<1x16xf32> to vector<8x16xf32>
    %27 = arith.mulf %25, %26 : vector<8x16xf32>
    %28 = arith.addf %22, %27 : vector<8x16xf32>
    %29 = vector.extract_strided_slice %10 {offsets = [0, 3], sizes = [8, 1], strides = [1, 1]} : vector<8x4xf32> to vector<8x1xf32>
    %30 = vector.extract_strided_slice %8 {offsets = [3, 0], sizes = [1, 16], strides = [1, 1]} : vector<4x16xf32> to vector<1x16xf32>
    %31 = vector.broadcast %29 : vector<8x1xf32> to vector<8x16xf32>
    %32 = vector.broadcast %30 : vector<1x16xf32> to vector<8x16xf32>
    %33 = arith.mulf %31, %32 : vector<8x16xf32>
    %34 = arith.addf %28, %33 : vector<8x16xf32>
    %c0_7 = arith.constant 0 : index
    %c0_8 = arith.constant 0 : index
    %c1 = arith.constant 1 : index
    %35 = vector.load %arg2[%c0_7, %c0_8, %c1] : memref<1x4x18xf32, #tpu.memory_space<vmem>>, vector<1x4x16xf32>
    %36 = vector.shape_cast %35 : vector<1x4x16xf32> to vector<4x16xf32>
    %37 = vector.extract_strided_slice %5 {offsets = [1, 0, 0], sizes = [1, 8, 4], strides = [1, 1, 1]} : vector<3x8x4xf32> to vector<1x8x4xf32>
    %38 = vector.shape_cast %37 : vector<1x8x4xf32> to vector<8x4xf32>
    %39 = vector.extract_strided_slice %38 {offsets = [0, 0], sizes = [8, 1], strides = [1, 1]} : vector<8x4xf32> to vector<8x1xf32>
    %40 = vector.extract_strided_slice %36 {offsets = [0, 0], sizes = [1, 16], strides = [1, 1]} : vector<4x16xf32> to vector<1x16xf32>
    %41 = vector.broadcast %39 : vector<8x1xf32> to vector<8x16xf32>
    %42 = vector.broadcast %40 : vector<1x16xf32> to vector<8x16xf32>
    %43 = arith.mulf %41, %42 : vector<8x16xf32>
    %44 = arith.addf %34, %43 : vector<8x16xf32>
    %45 = vector.extract_strided_slice %38 {offsets = [0, 1], sizes = [8, 1], strides = [1, 1]} : vector<8x4xf32> to vector<8x1xf32>
    %46 = vector.extract_strided_slice %36 {offsets = [1, 0], sizes = [1, 16], strides = [1, 1]} : vector<4x16xf32> to vector<1x16xf32>
    %47 = vector.broadcast %45 : vector<8x1xf32> to vector<8x16xf32>
    %48 = vector.broadcast %46 : vector<1x16xf32> to vector<8x16xf32>
    %49 = arith.mulf %47, %48 : vector<8x16xf32>
    %50 = arith.addf %44, %49 : vector<8x16xf32>
    %51 = vector.extract_strided_slice %38 {offsets = [0, 2], sizes = [8, 1], strides = [1, 1]} : vector<8x4xf32> to vector<8x1xf32>
    %52 = vector.extract_strided_slice %36 {offsets = [2, 0], sizes = [1, 16], strides = [1, 1]} : vector<4x16xf32> to vector<1x16xf32>
    %53 = vector.broadcast %51 : vector<8x1xf32> to vector<8x16xf32>
    %54 = vector.broadcast %52 : vector<1x16xf32> to vector<8x16xf32>
    %55 = arith.mulf %53, %54 : vector<8x16xf32>
    %56 = arith.addf %50, %55 : vector<8x16xf32>
    %57 = vector.extract_strided_slice %38 {offsets = [0, 3], sizes = [8, 1], strides = [1, 1]} : vector<8x4xf32> to vector<8x1xf32>
    %58 = vector.extract_strided_slice %36 {offsets = [3, 0], sizes = [1, 16], strides = [1, 1]} : vector<4x16xf32> to vector<1x16xf32>
    %59 = vector.broadcast %57 : vector<8x1xf32> to vector<8x16xf32>
    %60 = vector.broadcast %58 : vector<1x16xf32> to vector<8x16xf32>
    %61 = arith.mulf %59, %60 : vector<8x16xf32>
    %62 = arith.addf %56, %61 : vector<8x16xf32>
    %c0_9 = arith.constant 0 : index
    %c0_10 = arith.constant 0 : index
    %c2 = arith.constant 2 : index
    %63 = vector.load %arg2[%c0_9, %c0_10, %c2] : memref<1x4x18xf32, #tpu.memory_space<vmem>>, vector<1x4x16xf32>
    %64 = vector.shape_cast %63 : vector<1x4x16xf32> to vector<4x16xf32>
    %65 = vector.extract_strided_slice %5 {offsets = [2, 0, 0], sizes = [1, 8, 4], strides = [1, 1, 1]} : vector<3x8x4xf32> to vector<1x8x4xf32>
    %66 = vector.shape_cast %65 : vector<1x8x4xf32> to vector<8x4xf32>
    %67 = vector.extract_strided_slice %66 {offsets = [0, 0], sizes = [8, 1], strides = [1, 1]} : vector<8x4xf32> to vector<8x1xf32>
    %68 = vector.extract_strided_slice %64 {offsets = [0, 0], sizes = [1, 16], strides = [1, 1]} : vector<4x16xf32> to vector<1x16xf32>
    %69 = vector.broadcast %67 : vector<8x1xf32> to vector<8x16xf32>
    %70 = vector.broadcast %68 : vector<1x16xf32> to vector<8x16xf32>
    %71 = arith.mulf %69, %70 : vector<8x16xf32>
    %72 = arith.addf %62, %71 : vector<8x16xf32>
    %73 = vector.extract_strided_slice %66 {offsets = [0, 1], sizes = [8, 1], strides = [1, 1]} : vector<8x4xf32> to vector<8x1xf32>
    %74 = vector.extract_strided_slice %64 {offsets = [1, 0], sizes = [1, 16], strides = [1, 1]} : vector<4x16xf32> to vector<1x16xf32>
    %75 = vector.broadcast %73 : vector<8x1xf32> to vector<8x16xf32>
    %76 = vector.broadcast %74 : vector<1x16xf32> to vector<8x16xf32>
    %77 = arith.mulf %75, %76 : vector<8x16xf32>
    %78 = arith.addf %72, %77 : vector<8x16xf32>
    %79 = vector.extract_strided_slice %66 {offsets = [0, 2], sizes = [8, 1], strides = [1, 1]} : vector<8x4xf32> to vector<8x1xf32>
    %80 = vector.extract_strided_slice %64 {offsets = [2, 0], sizes = [1, 16], strides = [1, 1]} : vector<4x16xf32> to vector<1x16xf32>
    %81 = vector.broadcast %79 : vector<8x1xf32> to vector<8x16xf32>
    %82 = vector.broadcast %80 : vector<1x16xf32> to vector<8x16xf32>
    %83 = arith.mulf %81, %82 : vector<8x16xf32>
    %84 = arith.addf %78, %83 : vector<8x16xf32>
    %85 = vector.extract_strided_slice %66 {offsets = [0, 3], sizes = [8, 1], strides = [1, 1]} : vector<8x4xf32> to vector<8x1xf32>
    %86 = vector.extract_strided_slice %64 {offsets = [3, 0], sizes = [1, 16], strides = [1, 1]} : vector<4x16xf32> to vector<1x16xf32>
    %87 = vector.broadcast %85 : vector<8x1xf32> to vector<8x16xf32>
    %88 = vector.broadcast %86 : vector<1x16xf32> to vector<8x16xf32>
    %89 = arith.mulf %87, %88 : vector<8x16xf32>
    %90 = arith.addf %84, %89 : vector<8x16xf32>
    %c0_11 = arith.constant 0 : index
    %c0_12 = arith.constant 0 : index
    %91 = vector.load %arg4[%c0_11, %c0_12] : memref<8x2xf32, #tpu.memory_space<vmem>>, vector<8x1xf32>
    %cst_13 = arith.constant dense<0.000000e+00> : vector<8xf32>
    %92 = vector.multi_reduction <add>, %90, %cst_13 [1] : vector<8x16xf32> to vector<8xf32>
    %93 = vector.shape_cast %92 : vector<8xf32> to vector<8x1xf32>
    %94 = arith.addf %91, %93 : vector<8x1xf32>
    %c0_14 = arith.constant 0 : index
    %c0_15 = arith.constant 0 : index
    %95 = vector.load %arg4[%c0_14, %c0_15] : memref<8x2xf32, #tpu.memory_space<vmem>>, vector<8x1xf32>
    tpu.vector_store %arg4[%c0_14, %c0_15], %94 {strides = array<i32>} : memref<8x2xf32, #tpu.memory_space<vmem>>, vector<8x1xf32>,
    %c0_16 = arith.constant 0 : index
    %c1_17 = arith.constant 1 : index
    %96 = vector.load %arg4[%c0_16, %c1_17] : memref<8x2xf32, #tpu.memory_space<vmem>>, vector<8x1xf32>
    %97 = arith.mulf %90, %90 : vector<8x16xf32>
    %cst_18 = arith.constant dense<0.000000e+00> : vector<8xf32>
    %98 = vector.multi_reduction <add>, %97, %cst_18 [1] : vector<8x16xf32> to vector<8xf32>
    %99 = vector.shape_cast %98 : vector<8xf32> to vector<8x1xf32>
    %100 = arith.addf %96, %99 : vector<8x1xf32>
    %c0_19 = arith.constant 0 : index
    %c1_20 = arith.constant 1 : index
    %101 = vector.load %arg4[%c0_19, %c1_20] : memref<8x2xf32, #tpu.memory_space<vmem>>, vector<8x1xf32>
    tpu.vector_store %arg4[%c0_19, %c1_20], %100 {strides = array<i32>} : memref<8x2xf32, #tpu.memory_space<vmem>>, vector<8x1xf32>,
    return
  }
  func.func @transform_0(%arg0: i32, %arg1: i32) -> (i32, i32, i32) {
    %c0_i32 = arith.constant 0 : i32
    %c0_i32_0 = arith.constant 0 : i32
    %c0_i32_1 = arith.constant 0 : i32
    return %arg0, %c0_i32, %c0_i32_0 : i32, i32, i32
  }
  func.func @transform_1(%arg0: i32, %arg1: i32) -> (i32, i32, i32) {
    %c0_i32 = arith.constant 0 : i32
    %c0_i32_0 = arith.constant 0 : i32
    %c0_i32_1 = arith.constant 0 : i32
    %c0_i32_2 = arith.constant 0 : i32
    return %c0_i32, %c0_i32_0, %c0_i32_1 : i32, i32, i32
  }
  func.func @transform_2(%arg0: i32, %arg1: i32) -> (i32, i32) {
    %c0_i32 = arith.constant 0 : i32
    %c0_i32_0 = arith.constant 0 : i32
    %c0_i32_1 = arith.constant 0 : i32
    return %c0_i32, %c0_i32_0 : i32, i32
  }
}

module attributes {stable_mosaic.version = 11 : i64} {
  func.func @_conv_bn_relu_kernel(%arg0: i32, %arg1: i32, %arg2: memref<1x4x18xf32, #tpu.memory_space<vmem>>, %arg3: memref<3x8x4xf32, #tpu.memory_space<vmem>>, %arg4: memref<8x1xf32, #tpu.memory_space<vmem>>, %arg5: memref<8x1xf32, #tpu.memory_space<vmem>>, %arg6: memref<1x8x16xf32, #tpu.memory_space<vmem>>) attributes {dimension_semantics = [#tpu.dimension_semantics<parallel>, #tpu.dimension_semantics<parallel>], iteration_bounds = array<i64: 2, 1>, scalar_prefetch = 0 : i64, scratch_operands = 0 : i64, tpu.core_type = #tpu.core_type<tc>, window_params = [{transform_indices = @transform_0, window_bounds = array<i64: 1, 4, 18>}, {pipeline_mode = #tpu.pipeline_mode<synchronous>, transform_indices = @transform_1, window_bounds = array<i64: 3, 8, 4>}, {pipeline_mode = #tpu.pipeline_mode<synchronous>, transform_indices = @transform_2, window_bounds = array<i64: 8, 1>}, {pipeline_mode = #tpu.pipeline_mode<synchronous>, transform_indices = @transform_3, window_bounds = array<i64: 8, 1>}, {transform_indices = @transform_4, window_bounds = array<i64: 1, 8, 16>}]} {
    %c0 = arith.constant 0 : index
    %c0_0 = arith.constant 0 : index
    %c0_1 = arith.constant 0 : index
    %0 = vector.load %arg3[%c0, %c0_0, %c0_1] : memref<3x8x4xf32, #tpu.memory_space<vmem>>, vector<3x8x4xf32>
    %cst = arith.constant 0.000000e+00 : f32
    %1 = vector.broadcast %cst : f32 to vector<8x16xf32>
    %c0_2 = arith.constant 0 : index
    %c0_3 = arith.constant 0 : index
    %c0_4 = arith.constant 0 : index
    %2 = vector.load %arg2[%c0_2, %c0_3, %c0_4] : memref<1x4x18xf32, #tpu.memory_space<vmem>>, vector<1x4x16xf32>
    %3 = vector.shape_cast %2 : vector<1x4x16xf32> to vector<4x16xf32>
    %4 = vector.extract_strided_slice %0 {offsets = [0, 0, 0], sizes = [1, 8, 4], strides = [1, 1, 1]} : vector<3x8x4xf32> to vector<1x8x4xf32>
    %5 = vector.shape_cast %4 : vector<1x8x4xf32> to vector<8x4xf32>
    %6 = vector.extract_strided_slice %5 {offsets = [0, 0], sizes = [8, 1], strides = [1, 1]} : vector<8x4xf32> to vector<8x1xf32>
    %7 = vector.extract_strided_slice %3 {offsets = [0, 0], sizes = [1, 16], strides = [1, 1]} : vector<4x16xf32> to vector<1x16xf32>
    %8 = vector.broadcast %6 : vector<8x1xf32> to vector<8x16xf32>
    %9 = vector.broadcast %7 : vector<1x16xf32> to vector<8x16xf32>
    %10 = arith.mulf %8, %9 : vector<8x16xf32>
    %11 = arith.addf %1, %10 : vector<8x16xf32>
    %12 = vector.extract_strided_slice %5 {offsets = [0, 1], sizes = [8, 1], strides = [1, 1]} : vector<8x4xf32> to vector<8x1xf32>
    %13 = vector.extract_strided_slice %3 {offsets = [1, 0], sizes = [1, 16], strides = [1, 1]} : vector<4x16xf32> to vector<1x16xf32>
    %14 = vector.broadcast %12 : vector<8x1xf32> to vector<8x16xf32>
    %15 = vector.broadcast %13 : vector<1x16xf32> to vector<8x16xf32>
    %16 = arith.mulf %14, %15 : vector<8x16xf32>
    %17 = arith.addf %11, %16 : vector<8x16xf32>
    %18 = vector.extract_strided_slice %5 {offsets = [0, 2], sizes = [8, 1], strides = [1, 1]} : vector<8x4xf32> to vector<8x1xf32>
    %19 = vector.extract_strided_slice %3 {offsets = [2, 0], sizes = [1, 16], strides = [1, 1]} : vector<4x16xf32> to vector<1x16xf32>
    %20 = vector.broadcast %18 : vector<8x1xf32> to vector<8x16xf32>
    %21 = vector.broadcast %19 : vector<1x16xf32> to vector<8x16xf32>
    %22 = arith.mulf %20, %21 : vector<8x16xf32>
    %23 = arith.addf %17, %22 : vector<8x16xf32>
    %24 = vector.extract_strided_slice %5 {offsets = [0, 3], sizes = [8, 1], strides = [1, 1]} : vector<8x4xf32> to vector<8x1xf32>
    %25 = vector.extract_strided_slice %3 {offsets = [3, 0], sizes = [1, 16], strides = [1, 1]} : vector<4x16xf32> to vector<1x16xf32>
    %26 = vector.broadcast %24 : vector<8x1xf32> to vector<8x16xf32>
    %27 = vector.broadcast %25 : vector<1x16xf32> to vector<8x16xf32>
    %28 = arith.mulf %26, %27 : vector<8x16xf32>
    %29 = arith.addf %23, %28 : vector<8x16xf32>
    %c0_5 = arith.constant 0 : index
    %c0_6 = arith.constant 0 : index
    %c1 = arith.constant 1 : index
    %30 = vector.load %arg2[%c0_5, %c0_6, %c1] : memref<1x4x18xf32, #tpu.memory_space<vmem>>, vector<1x4x16xf32>
    %31 = vector.shape_cast %30 : vector<1x4x16xf32> to vector<4x16xf32>
    %32 = vector.extract_strided_slice %0 {offsets = [1, 0, 0], sizes = [1, 8, 4], strides = [1, 1, 1]} : vector<3x8x4xf32> to vector<1x8x4xf32>
    %33 = vector.shape_cast %32 : vector<1x8x4xf32> to vector<8x4xf32>
    %34 = vector.extract_strided_slice %33 {offsets = [0, 0], sizes = [8, 1], strides = [1, 1]} : vector<8x4xf32> to vector<8x1xf32>
    %35 = vector.extract_strided_slice %31 {offsets = [0, 0], sizes = [1, 16], strides = [1, 1]} : vector<4x16xf32> to vector<1x16xf32>
    %36 = vector.broadcast %34 : vector<8x1xf32> to vector<8x16xf32>
    %37 = vector.broadcast %35 : vector<1x16xf32> to vector<8x16xf32>
    %38 = arith.mulf %36, %37 : vector<8x16xf32>
    %39 = arith.addf %29, %38 : vector<8x16xf32>
    %40 = vector.extract_strided_slice %33 {offsets = [0, 1], sizes = [8, 1], strides = [1, 1]} : vector<8x4xf32> to vector<8x1xf32>
    %41 = vector.extract_strided_slice %31 {offsets = [1, 0], sizes = [1, 16], strides = [1, 1]} : vector<4x16xf32> to vector<1x16xf32>
    %42 = vector.broadcast %40 : vector<8x1xf32> to vector<8x16xf32>
    %43 = vector.broadcast %41 : vector<1x16xf32> to vector<8x16xf32>
    %44 = arith.mulf %42, %43 : vector<8x16xf32>
    %45 = arith.addf %39, %44 : vector<8x16xf32>
    %46 = vector.extract_strided_slice %33 {offsets = [0, 2], sizes = [8, 1], strides = [1, 1]} : vector<8x4xf32> to vector<8x1xf32>
    %47 = vector.extract_strided_slice %31 {offsets = [2, 0], sizes = [1, 16], strides = [1, 1]} : vector<4x16xf32> to vector<1x16xf32>
    %48 = vector.broadcast %46 : vector<8x1xf32> to vector<8x16xf32>
    %49 = vector.broadcast %47 : vector<1x16xf32> to vector<8x16xf32>
    %50 = arith.mulf %48, %49 : vector<8x16xf32>
    %51 = arith.addf %45, %50 : vector<8x16xf32>
    %52 = vector.extract_strided_slice %33 {offsets = [0, 3], sizes = [8, 1], strides = [1, 1]} : vector<8x4xf32> to vector<8x1xf32>
    %53 = vector.extract_strided_slice %31 {offsets = [3, 0], sizes = [1, 16], strides = [1, 1]} : vector<4x16xf32> to vector<1x16xf32>
    %54 = vector.broadcast %52 : vector<8x1xf32> to vector<8x16xf32>
    %55 = vector.broadcast %53 : vector<1x16xf32> to vector<8x16xf32>
    %56 = arith.mulf %54, %55 : vector<8x16xf32>
    %57 = arith.addf %51, %56 : vector<8x16xf32>
    %c0_7 = arith.constant 0 : index
    %c0_8 = arith.constant 0 : index
    %c2 = arith.constant 2 : index
    %58 = vector.load %arg2[%c0_7, %c0_8, %c2] : memref<1x4x18xf32, #tpu.memory_space<vmem>>, vector<1x4x16xf32>
    %59 = vector.shape_cast %58 : vector<1x4x16xf32> to vector<4x16xf32>
    %60 = vector.extract_strided_slice %0 {offsets = [2, 0, 0], sizes = [1, 8, 4], strides = [1, 1, 1]} : vector<3x8x4xf32> to vector<1x8x4xf32>
    %61 = vector.shape_cast %60 : vector<1x8x4xf32> to vector<8x4xf32>
    %62 = vector.extract_strided_slice %61 {offsets = [0, 0], sizes = [8, 1], strides = [1, 1]} : vector<8x4xf32> to vector<8x1xf32>
    %63 = vector.extract_strided_slice %59 {offsets = [0, 0], sizes = [1, 16], strides = [1, 1]} : vector<4x16xf32> to vector<1x16xf32>
    %64 = vector.broadcast %62 : vector<8x1xf32> to vector<8x16xf32>
    %65 = vector.broadcast %63 : vector<1x16xf32> to vector<8x16xf32>
    %66 = arith.mulf %64, %65 : vector<8x16xf32>
    %67 = arith.addf %57, %66 : vector<8x16xf32>
    %68 = vector.extract_strided_slice %61 {offsets = [0, 1], sizes = [8, 1], strides = [1, 1]} : vector<8x4xf32> to vector<8x1xf32>
    %69 = vector.extract_strided_slice %59 {offsets = [1, 0], sizes = [1, 16], strides = [1, 1]} : vector<4x16xf32> to vector<1x16xf32>
    %70 = vector.broadcast %68 : vector<8x1xf32> to vector<8x16xf32>
    %71 = vector.broadcast %69 : vector<1x16xf32> to vector<8x16xf32>
    %72 = arith.mulf %70, %71 : vector<8x16xf32>
    %73 = arith.addf %67, %72 : vector<8x16xf32>
    %74 = vector.extract_strided_slice %61 {offsets = [0, 2], sizes = [8, 1], strides = [1, 1]} : vector<8x4xf32> to vector<8x1xf32>
    %75 = vector.extract_strided_slice %59 {offsets = [2, 0], sizes = [1, 16], strides = [1, 1]} : vector<4x16xf32> to vector<1x16xf32>
    %76 = vector.broadcast %74 : vector<8x1xf32> to vector<8x16xf32>
    %77 = vector.broadcast %75 : vector<1x16xf32> to vector<8x16xf32>
    %78 = arith.mulf %76, %77 : vector<8x16xf32>
    %79 = arith.addf %73, %78 : vector<8x16xf32>
    %80 = vector.extract_strided_slice %61 {offsets = [0, 3], sizes = [8, 1], strides = [1, 1]} : vector<8x4xf32> to vector<8x1xf32>
    %81 = vector.extract_strided_slice %59 {offsets = [3, 0], sizes = [1, 16], strides = [1, 1]} : vector<4x16xf32> to vector<1x16xf32>
    %82 = vector.broadcast %80 : vector<8x1xf32> to vector<8x16xf32>
    %83 = vector.broadcast %81 : vector<1x16xf32> to vector<8x16xf32>
    %84 = arith.mulf %82, %83 : vector<8x16xf32>
    %85 = arith.addf %79, %84 : vector<8x16xf32>
    %c0_9 = arith.constant 0 : index
    %c0_10 = arith.constant 0 : index
    %86 = vector.load %arg4[%c0_9, %c0_10] : memref<8x1xf32, #tpu.memory_space<vmem>>, vector<8x1xf32>
    %87 = vector.broadcast %86 : vector<8x1xf32> to vector<8x16xf32>
    %88 = arith.mulf %85, %87 : vector<8x16xf32>
    %c0_11 = arith.constant 0 : index
    %c0_12 = arith.constant 0 : index
    %89 = vector.load %arg5[%c0_11, %c0_12] : memref<8x1xf32, #tpu.memory_space<vmem>>, vector<8x1xf32>
    %90 = vector.broadcast %89 : vector<8x1xf32> to vector<8x16xf32>
    %91 = arith.addf %88, %90 : vector<8x16xf32>
    %cst_13 = arith.constant 0.000000e+00 : f32
    %92 = vector.broadcast %cst_13 : f32 to vector<8x16xf32>
    %93 = arith.maximumf %91, %92 : vector<8x16xf32>
    %c0_14 = arith.constant 0 : index
    %c0_15 = arith.constant 0 : index
    %c0_16 = arith.constant 0 : index
    %94 = vector.load %arg6[%c0_14, %c0_15, %c0_16] : memref<1x8x16xf32, #tpu.memory_space<vmem>>, vector<1x8x16xf32>
    %95 = vector.shape_cast %94 : vector<1x8x16xf32> to vector<8x16xf32>
    %96 = vector.shape_cast %93 : vector<8x16xf32> to vector<1x8x16xf32>
    tpu.vector_store %arg6[%c0_14, %c0_15, %c0_16], %96 {strides = array<i32>} : memref<1x8x16xf32, #tpu.memory_space<vmem>>, vector<1x8x16xf32>,
    return
  }
  func.func @transform_0(%arg0: i32, %arg1: i32) -> (i32, i32, i32) {
    %c0_i32 = arith.constant 0 : i32
    %c0_i32_0 = arith.constant 0 : i32
    %c0_i32_1 = arith.constant 0 : i32
    return %arg0, %c0_i32, %c0_i32_0 : i32, i32, i32
  }
  func.func @transform_1(%arg0: i32, %arg1: i32) -> (i32, i32, i32) {
    %c0_i32 = arith.constant 0 : i32
    %c0_i32_0 = arith.constant 0 : i32
    %c0_i32_1 = arith.constant 0 : i32
    %c0_i32_2 = arith.constant 0 : i32
    return %c0_i32, %c0_i32_0, %c0_i32_1 : i32, i32, i32
  }
  func.func @transform_2(%arg0: i32, %arg1: i32) -> (i32, i32) {
    %c0_i32 = arith.constant 0 : i32
    %c0_i32_0 = arith.constant 0 : i32
    %c0_i32_1 = arith.constant 0 : i32
    return %c0_i32, %c0_i32_0 : i32, i32
  }
  func.func @transform_3(%arg0: i32, %arg1: i32) -> (i32, i32) {
    %c0_i32 = arith.constant 0 : i32
    %c0_i32_0 = arith.constant 0 : i32
    %c0_i32_1 = arith.constant 0 : i32
    return %c0_i32, %c0_i32_0 : i32, i32
  }
  func.func @transform_4(%arg0: i32, %arg1: i32) -> (i32, i32, i32) {
    %c0_i32 = arith.constant 0 : i32
    %c0_i32_0 = arith.constant 0 : i32
    return %arg0, %c0_i32, %arg1 : i32, i32, i32
  }
}

</mosaic_0001>

<bundles_post_ra>
// kernel: conv_module_forward.3
= control target key start
LH: loop header
LB: loop body
LE: loop exit
PB: predicated region body
PF: predicated region fallthrough
CT: control target
= control target key end

     0   :  { %9 = vsyncpa [#allocation3], 0  ;;  %s732_s0 = inlined_call_operand.vmem [shape: f32[2,4,18], index: 0, kind: input, shape index: {}]   ;;  %s733_s1 = inlined_call_operand.vmem [shape: f32[3,8,4], index: 1, kind: input, shape index: {}]   ;;  %s734_s2 = inlined_call_operand.vmem [shape: f32[8,1], index: 2, kind: input, shape index: {}]   ;;  %s735_s3 = inlined_call_operand.vmem [shape: f32[8,1], index: 3, kind: input, shape index: {}]   ;;  %s736_s4 = inlined_call_operand.hbm [shape: f32[2,8,16], index: 4, kind: output, shape index: {}]  }
   0x1   :  { %11 = vsyncpa [#allocation3 + $0x1], 0  ;;  %s620_s15 = smov 0   ;;  %s622_s16 = smov 0  }
   0x2   :  { %s624_s17 = smov 0   ;;  %s626_s18 = smov 0  }
   0x3   :  { %s628_s19 = smov 0   ;;  %s630_s20 = smov 0  }
   0x4 LB: > { %s424_s21 = sadd.s32 4294967295, %s587_s20   ;;  %s425_s22 = sadd.s32 4294967294, %s587_s20   ;;  %s587_s20 = sphi %s630_s20, %s17_s20   ;;  %s583_s19 = sphi %s628_s19, %s743_s19   ;;  %s579_s18 = sphi %s626_s18, %s742_s18   ;;  %s575_s17 = sphi %s624_s17, %s741_s17   ;;  %s571_s16 = sphi %s622_s16, %s740_s16   ;;  %s567_s15 = sphi %s620_s15, %s739_s15  }
   0x5   : > { %s29_s23 = sadd.s32 1, %s583_s19  ;;  %s127_s24 = sadd.s32 1, %s575_s17 }
   0x6   : > { %p31_p0 = scmp.ge.s32.totalorder %s29_s23, 2  ;;  %p137_p1 = scmp.ne.s32.totalorder %s575_s17, %s571_s16 }
   0x7   : > { %p138_p2 = scmp.eq.s32.totalorder %s424_s21, 1  ;;  %p143_p3 = scmp.ne.s32.totalorder %s571_s16, %s567_s15 }
   0x8   : > { %s745_s23 = smov (%p31_p0, %s29_s23), 0  ;;  %p144_p5 = scmp.eq.s32.totalorder %s425_s22, 1 }
   0x9   : > { %p660_p4 = por %p138_p2, %p137_p1  ;;  %s122_s26 = ssub.s32 %s583_s19, %s745_s23 }
   0xa   : > { %p428_p6 = scmp.ge.s32.totalorder %s587_s20, 1  ;;  %p125_p7 = scmp.eq.s32.totalorder %s122_s26, 0 }
   0xb   : > { %p667_p8 = por %p144_p5, %p143_p3  ;;  %p178_p9 = scmp.lt.s32.totalorder %s587_s20, 3 }
   0xc   : > { %s673_s28 = scalar_select %p125_p7, %s575_s17, %s127_s24  }
   0xd   : > { %p179_p10 = pnand %p428_p6, %p178_p9 }
   0xe   : > { %p203_p11 = scmp.lt.s32.totalorder (!%p179_p10), %s579_s18, 1  ;;  %s593_s14 = smov (!%p179_p10), 126  }
   0xf   : > { %182 = sbr.rel (%p179_p10) target bundleno = 288 (0x120), region = 36  ;;  %s594_s21 = smov (!%p179_p10), 127  }
  0x10   : > { %s200_s30 = sand.u32 (!%p179_p10), 1, %s571_s16   ;;  %s432_s6 = sshll.u32 (!%p179_p10), %s579_s18, 3 }
  0x11   : > { %s429_s5 = sshll.u32 (!%p179_p10), %s200_s30, 3  ;;  %s529_s24 = scalar_lea.hbm (!%p179_p10), %s736_s4, 16 }
  0x14   : > { %v208_v0 = vld [vmem:[%s733_s1 + $0x8] sm:$0xff]  ;;  %v589_v1 = vmov 1   ;;  %v590_v2 = vmov 0   ;;  %v591_v3 = vmov 3   ;;  %v207_v4 = vld [vmem:[%s733_s1] sm:$0xff]  ;;  %v592_v5 = vmov 2  }
  0x15   : > { %497 = vset.pattern.permute.xlu1 %v589_v1  ;;  %496 = vset.pattern.permute.xlu0 %v590_v2  ;;  %v209_v6 = vld [vmem:[%s733_s1 + $0x10] sm:$0xff]  ;;  %s204_s9 = scalar_select %p203_p11, %s579_s18, 1  ;;  %v322_v31 = vld [vmem:[%s734_s2] sm:$0xff]  ;;  %vm337_vm0 = vcmask 130048  }
  0x16   : > { %252 = vperm.xlu1 %497, %v208_v0   ;;  %242 = vperm.xlu0 %496, %v208_v0   ;;  %v329_v32 = vld [vmem:[%s735_s3] sm:$0xff] }
  0x17   : > { %499 = vset.pattern.permute.xlu2 %v591_v3  ;;  %s430_s10 = sshll.u32 %s204_s9, 2  ;;  %s351_s9 = scalar_lea.hbm %s736_s4, %s432_s6 }
  0x18   : > { %272 = vperm.xlu2 %499, %v208_v0   ;;  %s206_s13 = scalar_lea.vmem %s732_s0, %s430_s10  ;;  %s202_s10 = scalar_lea.vmem [#allocation2], %s429_s5 }
  0x19   : > { %v210_v8 = vld [vmem:[%s206_s13] sm:$0xf]  ;;  %s353_s11 = sshll.u32 %s202_s10, 4  ;;  %s355_s12 = sshll.u32 %s351_s9, 4  ;;  %s354_s11 = int_to_ptr.vmem [resolvable:$true] %s353_s11  ;;  %s356_s12 = int_to_ptr.hbm [resolvable:$true] %s355_s12 }
  0x1a   : > { %v216_v9 = vperm.slane %v210_v8, 0  ;;  %v237_v12 = vperm.slane %v210_v8, 3  ;;  %v223_v14 = vperm.slane %v210_v8, 1  ;;  %v230_v20 = vperm.slane %v210_v8, 2  ;;  %s340_s13 = scalar_lea.sflag [#allocation3], %s200_s30  ;;  %s523_s18 = sshra.s32 %s356_s12, 4  ;;  %s524_s18 = int_to_ptr.hbm [resolvable:$true] %s523_s18 }
  0x1b   : > { %p530_p1 = scmp.lt.s32.totalorder %s524_s18, %s736_s4 }
  0x1e   : > { %498 = vset.pattern.permute.xlu1 %v592_v5  ;;  %213 = vperm.xlu0 %496, %v207_v4  }
  0x1f   : > { %262 = vperm.xlu1 %498, %v208_v0  }
  0x20   : > { %500 = vset.pattern.permute.xlu2 %v590_v2 }
  0x21   : > { %283 = vperm.xlu2 %500, %v209_v6  }
  0x26   : > { %501 = vset.pattern.permute.xlu0 %v589_v1 }
  0x27   : > { %303 = vperm.xlu1 %498, %v209_v6   ;;  %293 = vperm.xlu0 %501, %v209_v6  }
  0x29   : > { %502 = vset.pattern.permute.xlu2 %v591_v3 }
  0x2a   : > { %313 = vperm.xlu2 %502, %v209_v6  }
  0x2f   : > { %503 = vset.pattern.permute.xlu1 %v589_v1  ;;  %505 = vset.pattern.permute.xlu0 %v591_v3 }
  0x30   : > { %220 = vperm.xlu1 %503, %v207_v4   ;;  %234 = vperm.xlu0 %505, %v207_v4  }
  0x32   : > { %504 = vset.pattern.permute.xlu2 %v592_v5 }
  0x33   : > { %227 = vperm.xlu2 %504, %v207_v4  }
  0x38   : > { %506 = vset.pattern.permute.xlu1 %v590_v2  ;;  %508 = vset.pattern.permute.xlu0 %v590_v2 }
  0x3b   : > { %507 = vset.pattern.permute.xlu2 %v590_v2 }
  0x72   : > { %v273_v7 = vpop.permute.xlu2 %272 }
  0x73   : > { %v275_v22 = vmul.f32 %v273_v7, %v237_v12 }
  0x7b   : > { %v284_v10 = vpop.permute.xlu2 %283 }
  0x7c   : > { %v286_v11 = vmul.f32 %v284_v10, %v216_v9 }
  0x7e   : > { %288 = vrot.lane.b32.xlu0 %v286_v11, %s593_s14 }
  0x84   : > { %v314_v13 = vpop.permute.xlu2 %313 }
  0x85   : > { %v316_v15 = vmul.f32 %v314_v13, %v237_v12 }
  0x87   : > { %318 = vrot.lane.b32.xlu0 %v316_v15, %s593_s14 }
  0x88   : > { %v253_v16 = vpop.permute.xlu1 %252  ;;  %v243_v17 = vpop.permute.xlu0 %242 }
  0x89   : > { %v255_v18 = vmul.f32 %v253_v16, %v223_v14  ;;  %v245_v19 = vmul.f32 %v243_v17, %v216_v9 }
  0x8b   : > { %257 = vrot.lane.b32.xlu2 %v255_v18, %s594_s21  ;;  %247 = vrot.lane.b32.xlu1 %v245_v19, %s594_s21 }
  0x8d   : > { %v228_v30 = vpop.permute.xlu2 %227 }
  0x8e   : > { %v231_v36 = vmul.f32 %v230_v20, %v228_v30 }
  0x90   : > { %v214_v21 = vpop.permute.xlu0 %213 }
  0x91   : > { %v217_v23 = vmul.f32 %v216_v9, %v214_v21  ;;  %v263_v24 = vpop.permute.xlu1 %262 }
  0x92   : > { %v265_v25 = vmul.f32 %v263_v24, %v230_v20 }
  0x93   : > { %277 = vrot.lane.b32.xlu2 %v275_v22, %s594_s21 }
  0x94   : > { %267 = vrot.lane.b32.xlu1 %v265_v25, %s594_s21 }
  0x99   : > { %v304_v26 = vpop.permute.xlu1 %303  ;;  %v294_v27 = vpop.permute.xlu0 %293 }
  0x9a   : > { %v306_v28 = vmul.f32 %v304_v26, %v230_v20  ;;  %v296_v29 = vmul.f32 %v294_v27, %v223_v14 }
  0x9c   : > { %308 = vrot.lane.b32.xlu2 %v306_v28, %s593_s14  ;;  %298 = vrot.lane.b32.xlu1 %v296_v29, %s593_s14  ;;  %s525_s14 = scalar_lea.hbm %s524_s18, 8 }
  0x9d   : > { %p526_p12 = scmp.ne.s32.totalorder %s524_s18, %s525_s14  ;;  %p531_p2 = scmp.lt.s32.totalorder %s529_s24, %s525_s14 }
  0x9f   : > { %p527_p13 = pnand %p526_p12, %p660_p4  ;;  %p532_p3 = por %p531_p2, %p530_p1 }
  0xa1   : > { %p528_p0 = pneg %p527_p13 }
  0xa2   : > { %v221_v33 = vpop.permute.xlu1 %220  ;;  %v235_v34 = vpop.permute.xlu0 %234 }
  0xa3   : > { %v224_v35 = vmul.f32 %v223_v14, %v221_v33  ;;  %v238_v38 = vmul.f32 %v237_v12, %v235_v34  ;;  %p533_p5 = pnand %p532_p3, %p528_p0 }
  0xa4   : > { %325 = vperm.xlu1 %506, %v322_v31   ;;  %332 = vperm.xlu2 %507, %v329_v32  }
  0xa5   : > { %v225_v37 = vadd.f32 %v224_v35, %v217_v23 }
  0xa7   : > { %v232_v39 = vadd.f32 %v231_v36, %v225_v37 }
  0xa9   : > { %v239_v40 = vadd.f32 %v238_v38, %v232_v39 }
  0xe5   : > { %v258_v41 = vpop.permute.xlu2 %257 }
  0xed   : > { %v278_v44 = vpop.permute.xlu2 %277 }
  0xf0   : > { %v289_v48 = vpop.permute.xlu0 %288 }
  0xf6   : > { %v309_v51 = vpop.permute.xlu2 %308 }
  0xf9   : > { %v319_v55 = vpop.permute.xlu0 %318 }
  0xfd   : > { %v248_v42 = vpop.permute.xlu1 %247 }
  0xfe   : > { %v250_v43 = vadd.f32 %v248_v42, %v239_v40  ;;  %v333_v58 = vpop.permute.xlu2 %332 }
 0x100   : > { %v260_v45 = vadd.f32 %v258_v41, %v250_v43 }
 0x106   : > { %v268_v46 = vpop.permute.xlu1 %267 }
 0x107   : > { %v270_v47 = vadd.f32 %v268_v46, %v260_v45 }
 0x109   : > { %v280_v49 = vadd.f32 %v278_v44, %v270_v47 }
 0x10b   : > { %v291_v50 = vadd.f32 %v289_v48, %v280_v49 }
 0x10e   : > { %v299_v52 = vpop.permute.xlu1 %298 }
 0x10f   : > { %v301_v53 = vadd.f32 %v299_v52, %v291_v50 }
 0x111   : > { %v311_v54 = vadd.f32 %v309_v51, %v301_v53 }
 0x113   : > { %v321_v56 = vadd.f32 %v319_v55, %v311_v54 }
 0x116   : > { %v326_v57 = vpop.permute.xlu1 %325 }
 0x117   : > { %v328_v59 = vmul.f32 %v326_v57, %v321_v56 }
 0x119   : > { %v335_v60 = vadd.f32 %v333_v58, %v328_v59 }
 0x11b   : > { %v336_v61 = vmax.f32 %v335_v60, 0.0 }
 0x11d   : > { %338 = vst.msk [vmem:[%s202_s10] sm:$0xff] %vm337_vm0, %v336_v61 }
 0x11e   : > { %536 = shalt.err (!%p533_p5)
}
 0x11f   : > { %435 = dma.vmem_to_hbm [thread:$0]  (%p660_p4), %s354_s11, 128, %s356_s12, %s340_s13  }
 0x120 PF: > { %p441_p6 = scmp.ge.s32.totalorder %s587_s20, 2  ;;  %s367_s30 = sand.u32 1, %s567_s15  }
 0x121   : > { %s368_s5 = scalar_lea.sflag [#allocation3], %s367_s30 }
 0x122   : > { %p438_p7 = pnand %p441_p6, %p667_p8 }
 0x124   : > { %p439_p9 = pneg %p438_p7 }
 0x126   : > { %562 = dma.done.wait (%p439_p9), %s368_s5, 128  }
 0x127   : > { %564 = vsyncadd (%p439_p9), %s368_s5, 4294967168  ;;  %s17_s20 = sadd.s32 1, %s587_s20   ;;  %s739_s15 = smov %s571_s16 }
 0x128   : > { %p14_p10 = scmp.ge.s32.totalorder %s17_s20, 4   ;;  %s740_s16 = smov %s575_s17 }
 0x129   : > { %s741_s17 = smov %s673_s28  ;;  %s742_s18 = smov %s583_s19 }
 0x12a   : > { %s743_s19 = smov %s745_s23  ;;  %16 = sbr.rel (!%p14_p10) target bundleno = 4 (0x4), region = 71 }
 0x12f   :  { %374 = vsyncpa [#allocation3], 1 }
 0x130   :  { %376 = vsyncpa [#allocation3 + $0x1], 1 }

// kernel: conv_module_forward.2
= control target key start
LH: loop header
LB: loop body
LE: loop exit
PB: predicated region body
PF: predicated region fallthrough
CT: control target
= control target key end

     0   :  { %s412_s9 = smov 0   ;;  %s414_s10 = smov 0   ;;  %s469_s0 = inlined_call_operand.vmem [shape: f32[2,4,18], index: 0, kind: input, shape index: {}]   ;;  %s470_s1 = inlined_call_operand.vmem [shape: f32[3,8,4], index: 1, kind: input, shape index: {}]   ;;  %s471_s2 = inlined_call_operand.vmem [shape: f32[8,2], index: 2, kind: output, shape index: {}]  }
   0x1   :  { %s416_s11 = smov 0  }
   0x2 LB: > { %s24_s12 = sadd.s32 1, %s384_s10  ;;  %p316_p0 = scmp.ge.s32.totalorder %s388_s11, 1  ;;  %s388_s11 = sphi %s416_s11, %s12_s11   ;;  %s384_s10 = sphi %s414_s10, %s473_s10   ;;  %s380_s9 = sphi %s412_s9, %s472_s9  }
   0x3   : > { %p26_p1 = scmp.ge.s32.totalorder %s24_s12, 2  ;;  %p118_p2 = scmp.lt.s32.totalorder %s388_s11, 3 }
   0x5   : > { %s475_s12 = smov (%p26_p1, %s24_s12), 0  ;;  %p119_p3 = pnand %p316_p0, %p118_p2 }
   0x6   : > { %p134_p4 = scmp.lt.s32.totalorder (!%p119_p3), %s380_s9, 1  ;;  %p138_p5 = scmp.eq.s32.totalorder (!%p119_p3), %s380_s9, 0 }
   0x7   : > { %122 = sbr.rel (%p119_p3) target bundleno = 408 (0x198), region = 28 }
   0xc   : > { %s477_s9 = smov (!%p134_p4, %s380_s9), 1  ;;  %143 = sbr.rel (!%p138_p5) target bundleno = 17 (0x11), region = 32  ;;  %vm144_vm0 = vcmask (%p138_p5), 15360   ;;  %v390_v0 = vmov (%p138_p5), 0.0  }
   0xd   : > { %s317_s13 = sshll.u32 %s477_s9, 2  ;;  %145 = vst.msk [vmem:[%s471_s2] sm:$0xff] (%p138_p5), %vm144_vm0, %v390_v0 }
   0xe   : > { %s433_s16 = scalar_lea.vmem %s469_s0, %s317_s13 }
  0x11 PF: > { %v147_v1 = vld [vmem:[%s470_s1 + $0x8] sm:$0xff]  ;;  %v391_v2 = vmov 0   ;;  %v392_v3 = vmov 2   ;;  %v148_v4 = vld [vmem:[%s470_s1 + $0x10] sm:$0xff]  ;;  %v393_v5 = vmov 1   ;;  %v394_v6 = vmov 3  }
  0x12   : > { %353 = vset.pattern.permute.xlu0 %v391_v2  ;;  %355 = vset.pattern.permute.xlu1 %v392_v3  ;;  %v146_v7 = vld [vmem:[%s470_s1] sm:$0xff]  ;;  %s395_s25 = smov 127   ;;  %s396_s26 = smov 126   ;;  %vm262_vm1 = vcmask 130048   ;;  %vm267_vm2 = vcmask 7168   ;;  %vm275_vm3 = vcmask 15368  }
  0x13   : > { %181 = vperm.xlu0 %353, %v147_v1   ;;  %201 = vperm.xlu1 %355, %v147_v1   ;;  %v149_v8 = vld [vmem:[%s433_s16] sm:$0xf] }
  0x14   : > { %357 = vset.pattern.permute.xlu2 %v391_v2  ;;  %v155_v10 = vperm.slane %v149_v8, 0  ;;  %v169_v11 = vperm.slane %v149_v8, 2  ;;  %v162_v17 = vperm.slane %v149_v8, 1  ;;  %v176_v19 = vperm.slane %v149_v8, 3  ;;  %v261_v59 = vld [vmem:[%s471_s2] sm:$0xff] }
  0x15   : > { %222 = vperm.xlu2 %357, %v148_v4  }
  0x1b   : > { %354 = vset.pattern.permute.xlu0 %v393_v5  ;;  %356 = vset.pattern.permute.xlu1 %v394_v6 }
  0x1c   : > { %191 = vperm.xlu0 %354, %v147_v1   ;;  %211 = vperm.xlu1 %356, %v147_v1  }
  0x1d   : > { %358 = vset.pattern.permute.xlu2 %v393_v5 }
  0x1e   : > { %232 = vperm.xlu2 %358, %v148_v4  }
  0x24   : > { %359 = vset.pattern.permute.xlu1 %v392_v3  ;;  %361 = vset.pattern.permute.xlu0 %v391_v2 }
  0x25   : > { %242 = vperm.xlu1 %359, %v148_v4   ;;  %152 = vperm.xlu0 %361, %v146_v7  }
  0x26   : > { %360 = vset.pattern.permute.xlu2 %v394_v6 }
  0x27   : > { %252 = vperm.xlu2 %360, %v148_v4  }
  0x2d   : > { %362 = vset.pattern.permute.xlu1 %v393_v5  ;;  %365 = vset.pattern.permute.xlu0 %v394_v6 }
  0x2e   : > { %159 = vperm.xlu1 %362, %v146_v7  }
  0x2f   : > { %363 = vset.pattern.permute.xlu2 %v392_v3 }
  0x30   : > { %166 = vperm.xlu2 %363, %v146_v7  }
  0x36   : > { %364 = vset.pattern.permute.xlu1 %v394_v6 }
  0x37   : > { %173 = vperm.xlu1 %364, %v146_v7  }
  0x6f   : > { %v223_v9 = vpop.permute.xlu2 %222 }
  0x70   : > { %v225_v24 = vmul.f32 %v223_v9, %v155_v10 }
  0x78   : > { %v233_v16 = vpop.permute.xlu2 %232 }
  0x79   : > { %v235_v18 = vmul.f32 %v233_v16, %v162_v17 }
  0x81   : > { %v253_v27 = vpop.permute.xlu2 %252 }
  0x82   : > { %v255_v29 = vmul.f32 %v253_v27, %v176_v19 }
  0x85   : > { %v182_v12 = vpop.permute.xlu0 %181  ;;  %v202_v13 = vpop.permute.xlu1 %201 }
  0x86   : > { %v184_v14 = vmul.f32 %v182_v12, %v155_v10  ;;  %v204_v15 = vmul.f32 %v202_v13, %v169_v11 }
  0x88   : > { %186 = vrot.lane.b32.xlu2 %v184_v14, %s395_s25  ;;  %206 = vrot.lane.b32.xlu1 %v204_v15, %s395_s25 }
  0x8a   : > { %v167_v34 = vpop.permute.xlu2 %166 }
  0x8b   : > { %v170_v36 = vmul.f32 %v169_v11, %v167_v34 }
  0x8e   : > { %v192_v20 = vpop.permute.xlu0 %191  ;;  %v212_v21 = vpop.permute.xlu1 %211 }
  0x8f   : > { %v194_v22 = vmul.f32 %v192_v20, %v162_v17  ;;  %v214_v23 = vmul.f32 %v212_v21, %v176_v19 }
  0x90   : > { %237 = vrot.lane.b32.xlu1 %v235_v18, %s396_s26 }
  0x91   : > { %196 = vrot.lane.b32.xlu0 %v194_v22, %s395_s25  ;;  %216 = vrot.lane.b32.xlu2 %v214_v23, %s395_s25 }
  0x97   : > { %v243_v25 = vpop.permute.xlu1 %242  ;;  %v153_v28 = vpop.permute.xlu0 %152 }
  0x98   : > { %v245_v26 = vmul.f32 %v243_v25, %v169_v11  ;;  %v156_v30 = vmul.f32 %v155_v10, %v153_v28 }
  0x99   : > { %227 = vrot.lane.b32.xlu0 %v225_v24, %s396_s26 }
  0x9a   : > { %247 = vrot.lane.b32.xlu2 %v245_v26, %s396_s26 }
  0xa0   : > { %v160_v31 = vpop.permute.xlu1 %159 }
  0xa1   : > { %257 = vrot.lane.b32.xlu0 %v255_v29, %s396_s26  ;;  %v163_v32 = vmul.f32 %v162_v17, %v160_v31 }
  0xa3   : > { %v164_v33 = vadd.f32 %v163_v32, %v156_v30 }
  0xa5   : > { %v171_v38 = vadd.f32 %v170_v36, %v164_v33 }
  0xa9   : > { %v174_v35 = vpop.permute.xlu1 %173 }
  0xaa   : > { %v177_v37 = vmul.f32 %v176_v19, %v174_v35 }
  0xac   : > { %v178_v39 = vadd.f32 %v177_v37, %v171_v38 }
  0xe2   : > { %v187_v40 = vpop.permute.xlu2 %186 }
  0xe3   : > { %v189_v41 = vadd.f32 %v187_v40, %v178_v39 }
  0xeb   : > { %v217_v45 = vpop.permute.xlu2 %216 }
  0xf4   : > { %v248_v52 = vpop.permute.xlu2 %247 }
  0xfa   : > { %v207_v42 = vpop.permute.xlu1 %206 }
 0x102   : > { %v238_v50 = vpop.permute.xlu1 %237 }
 0x103   : > { %v197_v43 = vpop.permute.xlu0 %196 }
 0x104   : > { %v199_v44 = vadd.f32 %v197_v43, %v189_v41 }
 0x106   : > { %v209_v46 = vadd.f32 %v207_v42, %v199_v44 }
 0x108   : > { %v219_v47 = vadd.f32 %v217_v45, %v209_v46 }
 0x10b   : > { %v228_v48 = vpop.permute.xlu0 %227 }
 0x10c   : > { %v230_v49 = vadd.f32 %v228_v48, %v219_v47 }
 0x10e   : > { %v240_v51 = vadd.f32 %v238_v50, %v230_v49 }
 0x110   : > { %v250_v53 = vadd.f32 %v248_v52, %v240_v51 }
 0x113   : > { %v258_v54 = vpop.permute.xlu0 %257 }
 0x114   : > { %v260_v55 = vadd.f32 %v258_v54, %v250_v53 }
 0x116   : > { %v263_v56 = vsel %vm262_vm1, %v260_v55, 0.0  ;;  %v270_v57 = vmul.f32 %v260_v55, %v260_v55 }
 0x117   : > { %264 = vadd.xlane.f32.xlu1 %v263_v56 }
 0x118   : > { %v271_v58 = vsel %vm262_vm1, %v270_v57, 0.0 }
 0x119   : > { %272 = vadd.xlane.f32.xlu2 %v271_v58 }
 0x18a   : > { %v265_v60 = vpop.xlane.xlu1 %264 }
 0x18b   : > { %v266_v61 = vadd.f32 %v265_v60, %v261_v59 }
 0x18c   : > { %v273_v62 = vpop.xlane.xlu2 %272 }
 0x18d   : > { %268 = vst.msk [vmem:[%s471_s2] sm:$0xff] %vm267_vm2, %v266_v61 }
 0x194   : > { %v269_v63 = vld [vmem:[%s471_s2] sm:$0xff] }
 0x195   : > { %v274_v0 = vadd.f32 %v273_v62, %v269_v63 }
 0x197   : > { %276 = vst.msk [vmem:[%s471_s2] sm:$0xff] %vm275_vm3, %v274_v0 }
 0x198 PF: > { %s12_s11 = sadd.s32 1, %s388_s11   ;;  %s472_s9 = smov %s384_s10 }
 0x199   : > { %p9_p6 = scmp.ge.s32.totalorder %s12_s11, 4   ;;  %s473_s10 = smov %s475_s12 }
 0x19b   :  { %11 = sbr.rel (!%p9_p6) target bundleno = 2 (0x2), region = 58 }

</bundles_post_ra>
